<compile_context>
chip_gen: v7x
topology: tpu7x:2x2x1
jax: 0.10.0
libtpu: 0.0.40
codegen_flags: <defaults>
</compile_context>

<pallas_src>
import functools

import jax
import jax.numpy as jnp
from jax.experimental import pallas as pl
from jax.experimental.pallas import tpu as pltpu

IMAGE_HEIGHT = 28
IMAGE_WIDTH = 28
NUM_CHANNELS = 1
NUM_CLASSES = 10
IN_FEATURES = IMAGE_HEIGHT * IMAGE_WIDTH * NUM_CHANNELS  # 784 (a multiple of 8)
HIDDEN1 = 256
HIDDEN2 = 128

LANE = 128
SUBLANE = 8
OUT_PAD = LANE  # lane-dense logits slab: 10 real + 118 zero columns


def _round_up(x, m):
    return ((x + m - 1) // m) * m


def mlp_kernel(x_ref, w1_ref, b1_ref, w2_ref, b2_ref, w3_ref, b3_ref, o_ref):
    """One batch tile: Flatten -> L1 -> ReLU -> (Dropout=id) -> L2 -> ReLU -> (Dropout=id) -> L3."""
    # x arrives as raw f32 (no wrapper pre-pass); cast to bf16 in-kernel.
    x = x_ref[...].astype(jnp.bfloat16)                                   # [TB, 784]

    # Layer 1: Linear(784 -> 256) + ReLU, f32 MXU accumulation.
    h1 = jnp.dot(x, w1_ref[...], preferred_element_type=jnp.float32) + b1_ref[...]
    h1 = jnp.maximum(h1, 0.0).astype(jnp.bfloat16)
    # Dropout(p=0.2): identity in eval mode.
    # TODO(synk): train-mode dropout (p=0.2) would need pltpu.prng_seed/prng_random_bits.

    # Layer 2: Linear(256 -> 128) + ReLU.
    h2 = jnp.dot(h1, w2_ref[...], preferred_element_type=jnp.float32) + b2_ref[...]
    h2 = jnp.maximum(h2, 0.0).astype(jnp.bfloat16)
    # Dropout(p=0.2): identity in eval mode.

    # Layer 3: Linear(128 -> 10), stored into a lane-dense 128-wide f32 slab.
    o_ref[...] = jnp.dot(h2, w3_ref[...], preferred_element_type=jnp.float32) + b3_ref[...]


def prep_params(params):
    """One-time prep: transpose to (in, out), pad the tiny head to 128 cols, cast to bf16."""
    w1, b1, w2, b2, w3, b3 = params
    w1_t = w1.T.astype(jnp.bfloat16)                                      # [784, 256] (unpadded)
    w2_t = w2.T.astype(jnp.bfloat16)                                      # [256, 128]
    w3_t = jnp.pad(w3.T.astype(jnp.bfloat16),
                   ((0, 0), (0, OUT_PAD - NUM_CLASSES)))                  # [128, 128]
    b1_2d = b1.reshape(1, -1).astype(jnp.float32)                         # [1, 256]
    b2_2d = b2.reshape(1, -1).astype(jnp.float32)                         # [1, 128]
    b3_2d = jnp.pad(b3.reshape(1, -1).astype(jnp.float32),
                    ((0, 0), (0, OUT_PAD - NUM_CLASSES)))                 # [1, 128]
    return (w1_t, b1_2d, w2_t, b2_2d, w3_t, b3_2d)


def _choose_tb(B, tb):
    """Batch tile: multiple of 8 (small B) / 256 (large B), capped at `tb`, and
    sized so large batches give >= 2 grid steps (v7x has 2 TensorCores)."""
    b_r = _round_up(B, SUBLANE)
    if b_r <= 512:
        return b_r                                    # single tile, multiple of 8
    tb = max(256, (int(tb) // 256) * 256)             # MXU-friendly multiple of 256
    return min(tb, max(256, 256 * (b_r // 512)))      # >= 2 tiles for b_r > 512


@functools.partial(jax.jit, static_argnames=("tb",))
def fmnist_net_forward(x_nchw, prepped, tb=1024):
    """x_nchw: [B, C, H, W] f32. prepped: output of prep_params. Returns [B, 10] f32."""
    w1_t, b1, w2_t, b2, w3_t, b3 = prepped
    B = x_nchw.shape[0]

    TB = _choose_tb(B, tb)
    B_pad = _round_up(B, TB)

    # nn.Flatten(): row-major flatten of (C, H, W).  Metadata-only reshape; no cast,
    # no K padding.  Batch pad only when B is not a tile multiple (cheap / elided).
    x2d = x_nchw.reshape(B, IN_FEATURES)
    if B_pad != B:
        x2d = jnp.pad(x2d, ((0, B_pad - B), (0, 0)))

    grid = (B_pad // TB,)
    out = pl.pallas_call(
        mlp_kernel,
        out_shape=jax.ShapeDtypeStruct((B_pad, OUT_PAD), jnp.float32),
        grid=grid,
        in_specs=[
            pl.BlockSpec((TB, IN_FEATURES), lambda i: (i, 0)),       # x streams per tile
            pl.BlockSpec((IN_FEATURES, HIDDEN1), lambda i: (0, 0)),  # resident weights
            pl.BlockSpec((1, HIDDEN1), lambda i: (0, 0)),
            pl.BlockSpec((HIDDEN1, HIDDEN2), lambda i: (0, 0)),
            pl.BlockSpec((1, HIDDEN2), lambda i: (0, 0)),
            pl.BlockSpec((HIDDEN2, OUT_PAD), lambda i: (0, 0)),
            pl.BlockSpec((1, OUT_PAD), lambda i: (0, 0)),
        ],
        out_specs=pl.BlockSpec((TB, OUT_PAD), lambda i: (i, 0)),
        compiler_params=pltpu.CompilerParams(
            dimension_semantics=("parallel",),
        ),
    )(x2d, w1_t, b1, w2_t, b2, w3_t, b3)

    # Trim batch padding and the lane padding of the 10-class head.
    return out[:B, :NUM_CLASSES]


def init_params(key):
    """Deterministic init mirroring torch.nn.Linear default (uniform +-1/sqrt(fan_in))."""
    def linear(key, out_f, in_f):
        kw, kb = jax.random.split(key)
        bound = 1.0 / (in_f ** 0.5)
        w = jax.random.uniform(kw, (out_f, in_f), jnp.float32, -bound, bound)
        b = jax.random.uniform(kb, (out_f,), jnp.float32, -bound, bound)
        return w, b

    k1, k2, k3 = jax.random.split(key, 3)
    w1, b1 = linear(k1, HIDDEN1, IN_FEATURES)
    w2, b2 = linear(k2, HIDDEN2, HIDDEN1)
    w3, b3 = linear(k3, NUM_CLASSES, HIDDEN2)
    return (w1, b1, w2, b2, w3, b3)


if __name__ == "__main__":
    key = jax.random.PRNGKey(0)
    k_params, k_x = jax.random.split(key)

    params = init_params(k_params)
    prepped = prep_params(params)

    # Small batch of FMNIST-shaped inputs: [B, C, H, W] = [2, 1, 28, 28]
    x = jax.random.normal(k_x, (2, NUM_CHANNELS, IMAGE_HEIGHT, IMAGE_WIDTH), jnp.float32)

    logits = fmnist_net_forward(x, prepped)
    logits = jax.block_until_ready(logits)

    # Pure-JAX reference with matching bf16-matmul / f32-accumulate precision.
    w1, b1, w2, b2, w3, b3 = params
    xf = x.reshape(x.shape[0], -1).astype(jnp.bfloat16)
    h = jnp.dot(xf, w1.T.astype(jnp.bfloat16), preferred_element_type=jnp.float32) + b1
    h = jnp.maximum(h, 0.0).astype(jnp.bfloat16)
    h = jnp.dot(h, w2.T.astype(jnp.bfloat16), preferred_element_type=jnp.float32) + b2
    h = jnp.maximum(h, 0.0).astype(jnp.bfloat16)
    ref = jnp.dot(h, w3.T.astype(jnp.bfloat16), preferred_element_type=jnp.float32) + b3

    assert logits.shape == (2, NUM_CLASSES)
    assert jnp.allclose(logits, ref, atol=2e-2, rtol=2e-2), (
        float(jnp.max(jnp.abs(logits - ref))))

    print("KERNEL_OK")
</pallas_src>

<mosaic_0001>
module attributes {stable_mosaic.version = 11 : i64} {
  func.func @mlp_kernel(%arg0: i32, %arg1: memref<8x784xf32, #tpu.memory_space<vmem>>, %arg2: memref<784x256xbf16, #tpu.memory_space<vmem>>, %arg3: memref<1x256xf32, #tpu.memory_space<vmem>>, %arg4: memref<256x128xbf16, #tpu.memory_space<vmem>>, %arg5: memref<1x128xf32, #tpu.memory_space<vmem>>, %arg6: memref<128x128xbf16, #tpu.memory_space<vmem>>, %arg7: memref<1x128xf32, #tpu.memory_space<vmem>>, %arg8: memref<8x128xf32, #tpu.memory_space<vmem>>) attributes {dimension_semantics = [#tpu.dimension_semantics<parallel>], iteration_bounds = array<i64: 1>, scalar_prefetch = 0 : i64, scratch_operands = 0 : i64, tpu.core_type = #tpu.core_type<tc>, window_params = [{transform_indices = @transform_0, window_bounds = array<i64: 8, 784>}, {pipeline_mode = #tpu.pipeline_mode<synchronous>, transform_indices = @transform_1, window_bounds = array<i64: 784, 256>}, {pipeline_mode = #tpu.pipeline_mode<synchronous>, transform_indices = @transform_2, window_bounds = array<i64: 1, 256>}, {pipeline_mode = #tpu.pipeline_mode<synchronous>, transform_indices = @transform_3, window_bounds = array<i64: 256, 128>}, {pipeline_mode = #tpu.pipeline_mode<synchronous>, transform_indices = @transform_4, window_bounds = array<i64: 1, 128>}, {pipeline_mode = #tpu.pipeline_mode<synchronous>, transform_indices = @transform_5, window_bounds = array<i64: 128, 128>}, {pipeline_mode = #tpu.pipeline_mode<synchronous>, transform_indices = @transform_6, window_bounds = array<i64: 1, 128>}, {transform_indices = @transform_7, window_bounds = array<i64: 8, 128>}]} {
    %c0 = arith.constant 0 : index
    %c0_0 = arith.constant 0 : index
    %0 = vector.load %arg1[%c0, %c0_0] : memref<8x784xf32, #tpu.memory_space<vmem>>, vector<8x784xf32>
    %1 = arith.truncf %0 : vector<8x784xf32> to vector<8x784xbf16>
    %c0_1 = arith.constant 0 : index
    %c0_2 = arith.constant 0 : index
    %2 = vector.load %arg2[%c0_1, %c0_2] : memref<784x256xbf16, #tpu.memory_space<vmem>>, vector<784x256xbf16>
    %cst = arith.constant dense<0.000000e+00> : vector<8x256xf32>
    %3 = tpu.matmul %1, %2, %cst {dimension_numbers = #tpu.dot_dimension_numbers<[1], [0], [0], [1], [0, 0, 1, 1], [], []>} : vector<8x784xbf16>, vector<784x256xbf16>, vector<8x256xf32> -> vector<8x256xf32>
    %c0_3 = arith.constant 0 : index
    %c0_4 = arith.constant 0 : index
    %4 = vector.load %arg3[%c0_3, %c0_4] : memref<1x256xf32, #tpu.memory_space<vmem>>, vector<1x256xf32>
    %5 = vector.broadcast %4 : vector<1x256xf32> to vector<8x256xf32>
    %6 = arith.addf %3, %5 : vector<8x256xf32>
    %cst_5 = arith.constant 0.000000e+00 : f32
    %7 = vector.broadcast %cst_5 : f32 to vector<8x256xf32>
    %8 = arith.maximumf %6, %7 : vector<8x256xf32>
    %9 = arith.truncf %8 : vector<8x256xf32> to vector<8x256xbf16>
    %c0_6 = arith.constant 0 : index
    %c0_7 = arith.constant 0 : index
    %10 = vector.load %arg4[%c0_6, %c0_7] : memref<256x128xbf16, #tpu.memory_space<vmem>>, vector<256x128xbf16>
    %cst_8 = arith.constant dense<0.000000e+00> : vector<8x128xf32>
    %11 = tpu.matmul %9, %10, %cst_8 {dimension_numbers = #tpu.dot_dimension_numbers<[1], [0], [0], [1], [0, 0, 1, 1], [], []>} : vector<8x256xbf16>, vector<256x128xbf16>, vector<8x128xf32> -> vector<8x128xf32>
    %c0_9 = arith.constant 0 : index
    %c0_10 = arith.constant 0 : index
    %12 = vector.load %arg5[%c0_9, %c0_10] : memref<1x128xf32, #tpu.memory_space<vmem>>, vector<1x128xf32>
    %13 = vector.broadcast %12 : vector<1x128xf32> to vector<8x128xf32>
    %14 = arith.addf %11, %13 : vector<8x128xf32>
    %cst_11 = arith.constant 0.000000e+00 : f32
    %15 = vector.broadcast %cst_11 : f32 to vector<8x128xf32>
    %16 = arith.maximumf %14, %15 : vector<8x128xf32>
    %17 = arith.truncf %16 : vector<8x128xf32> to vector<8x128xbf16>
    %c0_12 = arith.constant 0 : index
    %c0_13 = arith.constant 0 : index
    %18 = vector.load %arg6[%c0_12, %c0_13] : memref<128x128xbf16, #tpu.memory_space<vmem>>, vector<128x128xbf16>
    %cst_14 = arith.constant dense<0.000000e+00> : vector<8x128xf32>
    %19 = tpu.matmul %17, %18, %cst_14 {dimension_numbers = #tpu.dot_dimension_numbers<[1], [0], [0], [1], [0, 0, 1, 1], [], []>} : vector<8x128xbf16>, vector<128x128xbf16>, vector<8x128xf32> -> vector<8x128xf32>
    %c0_15 = arith.constant 0 : index
    %c0_16 = arith.constant 0 : index
    %20 = vector.load %arg7[%c0_15, %c0_16] : memref<1x128xf32, #tpu.memory_space<vmem>>, vector<1x128xf32>
    %21 = vector.broadcast %20 : vector<1x128xf32> to vector<8x128xf32>
    %22 = arith.addf %19, %21 : vector<8x128xf32>
    %c0_17 = arith.constant 0 : index
    %c0_18 = arith.constant 0 : index
    %23 = vector.load %arg8[%c0_17, %c0_18] : memref<8x128xf32, #tpu.memory_space<vmem>>, vector<8x128xf32>
    tpu.vector_store %arg8[%c0_17, %c0_18], %22 {strides = array<i32>} : memref<8x128xf32, #tpu.memory_space<vmem>>, vector<8x128xf32>,
    return
  }
  func.func @transform_0(%arg0: i32) -> (i32, i32) {
    %c0_i32 = arith.constant 0 : i32
    %c0_i32_0 = arith.constant 0 : i32
    return %arg0, %c0_i32 : i32, i32
  }
  func.func @transform_1(%arg0: i32) -> (i32, i32) {
    %c0_i32 = arith.constant 0 : i32
    %c0_i32_0 = arith.constant 0 : i32
    %c0_i32_1 = arith.constant 0 : i32
    return %c0_i32, %c0_i32_0 : i32, i32
  }
  func.func @transform_2(%arg0: i32) -> (i32, i32) {
    %c0_i32 = arith.constant 0 : i32
    %c0_i32_0 = arith.constant 0 : i32
    %c0_i32_1 = arith.constant 0 : i32
    return %c0_i32, %c0_i32_0 : i32, i32
  }
  func.func @transform_3(%arg0: i32) -> (i32, i32) {
    %c0_i32 = arith.constant 0 : i32
    %c0_i32_0 = arith.constant 0 : i32
    %c0_i32_1 = arith.constant 0 : i32
    return %c0_i32, %c0_i32_0 : i32, i32
  }
  func.func @transform_4(%arg0: i32) -> (i32, i32) {
    %c0_i32 = arith.constant 0 : i32
    %c0_i32_0 = arith.constant 0 : i32
    %c0_i32_1 = arith.constant 0 : i32
    return %c0_i32, %c0_i32_0 : i32, i32
  }
  func.func @transform_5(%arg0: i32) -> (i32, i32) {
    %c0_i32 = arith.constant 0 : i32
    %c0_i32_0 = arith.constant 0 : i32
    %c0_i32_1 = arith.constant 0 : i32
    return %c0_i32, %c0_i32_0 : i32, i32
  }
  func.func @transform_6(%arg0: i32) -> (i32, i32) {
    %c0_i32 = arith.constant 0 : i32
    %c0_i32_0 = arith.constant 0 : i32
    %c0_i32_1 = arith.constant 0 : i32
    return %c0_i32, %c0_i32_0 : i32, i32
  }
  func.func @transform_7(%arg0: i32) -> (i32, i32) {
    %c0_i32 = arith.constant 0 : i32
    %c0_i32_0 = arith.constant 0 : i32
    return %arg0, %c0_i32 : i32, i32
  }
}

</mosaic_0001>

<bundles_post_ra>
// kernel: fmnist_net_forward.1
= control target key start
LH: loop header
LB: loop body
LE: loop exit
PB: predicated region body
PF: predicated region fallthrough
CT: control target
= control target key end

     0   :  { %12 = vsyncpa [#allocation3], 0  ;;  %s1510_s24 = smov [#allocation2]   ;;  %s1673_s0 = inlined_call_operand.vmem [shape: f32[8,784], index: 0, kind: input, shape index: {}]   ;;  %s1674_s1 = inlined_call_operand.hbm [shape: bf16[784,256], index: 1, kind: input, shape index: {}]   ;;  %s1675_s2 = inlined_call_operand.vmem [shape: f32[1,256], index: 2, kind: input, shape index: {}]   ;;  %s1676_s3 = inlined_call_operand.vmem [shape: bf16[256,128], index: 3, kind: input, shape index: {}]   ;;  %s1677_s4 = inlined_call_operand.vmem [shape: f32[1,128], index: 4, kind: input, shape index: {}]   ;;  %s1678_s5 = inlined_call_operand.vmem [shape: bf16[128,128], index: 5, kind: input, shape index: {}]   ;;  %s1679_s6 = inlined_call_operand.vmem [shape: f32[1,128], index: 6, kind: input, shape index: {}]   ;;  %s1680_s7 = inlined_call_operand.vmem [shape: f32[8,128], index: 7, kind: output, shape index: {}]  }
   0x1   :  { %s20_s25 = sshll.u32 %s1510_s24, 4  ;;  %s1486_s28 = scalar_lea.hbm %s1674_s1, 12544  ;;  %s21_s25 = int_to_ptr.vmem [resolvable:$true] %s20_s25 }
   0x2   :  { %p1487_p0 = scmp.ne.s32.totalorder %s1674_s1, %s1486_s28  ;;  %p1490_p1 = scmp.lt.u32.totalorder %s1486_s28, %s1674_s1 }
   0x4   :  { %p1492_p2 = pnand %p1490_p1, %p1487_p0 }
   0x6   :  { %1495 = shalt.err (!%p1492_p2)
}
   0x7   :  { %s1496_s10 = scalar_lea.vmem %s21_s25, 12544  ;;  %p1501_p4 = scmp.lt.s32.totalorder %s21_s25, %s21_s25 }
   0x8   :  { %p1497_p3 = scmp.ne.s32.totalorder %s21_s25, %s1496_s10  ;;  %p1502_p5 = scmp.lt.s32.totalorder %s1496_s10, %s1496_s10 }
   0xa   :  { %p1503_p6 = por %p1502_p5, %p1501_p4 }
   0xc   :  { %p1504_p7 = pnand %p1503_p6, %p1497_p3 }
   0xe   :  { %1507 = shalt.err (!%p1504_p7)
}
   0xf   :  { %s1511_s11 = smov 128   ;;  %s1512_s12 = smov 8  }
  0x10   :  { %26 = dma.hbm_to_vmem [thread:$0]  %s1674_s1, 12544, %s21_s25, [#allocation3], %s1511_s11, %s1511_s11, %s1512_s12  }
  0x11   :  { %1508 = dma.done.wait [#allocation3], 12544  }
  0x12   :  { %1509 = vsyncadd [#allocation3], 4294954752  ;;  %v1315_v0 = vld [vmem:[#allocation2 + $0x104] ss:$8 sps:$4 sm:$0xff]   ;;  %v1317_v1 = vld [vmem:[#allocation2 + $0x100] ss:$8 sps:$4 sm:$0xff]  }
  0x13   :  { %700 = vmatprep.subr.bf16.mxu0 %v1315_v0  ;;  %v1318_v2 = vld [vmem:[#allocation2 + $0x114] ss:$8 sps:$4 sm:$0xff]   ;;  %v1320_v3 = vld [vmem:[#allocation2 + $0x110] ss:$8 sps:$4 sm:$0xff]   ;;  %v1321_v4 = vld [vmem:[#allocation2 + $0x124] ss:$8 sps:$4 sm:$0xff]  }
  0x14   :  { %701 = vmatpush1.bf16.msra.mxu0 %v1317_v1  ;;  %v1323_v5 = vld [vmem:[#allocation2 + $0x120] ss:$8 sps:$4 sm:$0xff]   ;;  %v1324_v6 = vld [vmem:[#allocation2 + $0x134] ss:$8 sps:$4 sm:$0xff]   ;;  %v1326_v7 = vld [vmem:[#allocation2 + $0x130] ss:$8 sps:$4 sm:$0xff]  }
  0x15   :  { %702 = vmatprep.subr.bf16.mxu0 %v1318_v2  ;;  %v1327_v8 = vld [vmem:[#allocation2 + $0x144] ss:$8 sps:$4 sm:$0xff]   ;;  %v1329_v9 = vld [vmem:[#allocation2 + $0x140] ss:$8 sps:$4 sm:$0xff]   ;;  %v1330_v10 = vld [vmem:[#allocation2 + $0x154] ss:$8 sps:$4 sm:$0xff]  }
  0x16   :  { %v1332_v11 = vld [vmem:[#allocation2 + $0x150] ss:$8 sps:$4 sm:$0xff]   ;;  %v1333_v12 = vld [vmem:[#allocation2 + $0x164] ss:$8 sps:$4 sm:$0xff]   ;;  %v1335_v15 = vld [vmem:[#allocation2 + $0x160] ss:$8 sps:$4 sm:$0xff]  }
  0x17   :  { %v44_v13 = vld [vmem:[%s1673_s0 + $0x18] sm:$0xff]  ;;  %v1369_v17 = vld [vmem:[#allocation2 + $0x4] ss:$8 sps:$4 sm:$0xff]   ;;  %v1374_v20 = vld [vmem:[#allocation2] ss:$8 sps:$4 sm:$0xff]   ;;  %vm655_vm0 = vcmask 130048  }
  0x18   :  { %703 = vmatpush1.bf16.msra.mxu0 %v1320_v3  ;;  %v51_v14 = vpack.c.bf16 %v44_v13, %v44_v13  ;;  %v1336_v16 = vld [vmem:[#allocation2 + $0x174] ss:$8 sps:$4 sm:$0xff]   ;;  %v1338_v18 = vld [vmem:[#allocation2 + $0x170] ss:$8 sps:$4 sm:$0xff]   ;;  %v1339_v19 = vld [vmem:[#allocation2 + $0x184] ss:$8 sps:$4 sm:$0xff]   ;;  %659 = vmatprep.subr.bf16.mxu1 %v1369_v17 }
  0x19   :  { %704 = vmatprep.subr.bf16.mxu0 %v1321_v4  ;;  %v1375_v21 = vld [vmem:[#allocation2 + $0x14] ss:$8 sps:$4 sm:$0xff]   ;;  %660 = vmatpush1.bf16.msra.mxu1 %v1374_v20  ;;  %v1380_v22 = vld [vmem:[#allocation2 + $0x10] ss:$8 sps:$4 sm:$0xff]   ;;  %v1381_v23 = vld [vmem:[#allocation2 + $0x24] ss:$8 sps:$4 sm:$0xff]  }
  0x1a   :  { %732 = vmatprep.mubr.bf16.mxu0 %v51_v14  ;;  %661 = vmatprep.subr.bf16.mxu1 %v1375_v21  ;;  %v1341_v24 = vld [vmem:[#allocation2 + $0x180] ss:$8 sps:$4 sm:$0xff]   ;;  %v1342_v25 = vld [vmem:[#allocation2 + $0x194] ss:$8 sps:$4 sm:$0xff]   ;;  %v1344_v28 = vld [vmem:[#allocation2 + $0x190] ss:$8 sps:$4 sm:$0xff]  }
  0x1b   :  { %v1386_v26 = vld [vmem:[#allocation2 + $0x20] ss:$8 sps:$4 sm:$0xff]   ;;  %v1387_v27 = vld [vmem:[#allocation2 + $0x34] ss:$8 sps:$4 sm:$0xff]   ;;  %v1345_v29 = vld [vmem:[#allocation2 + $0x1a4] ss:$8 sps:$4 sm:$0xff]  }
  0x1c   :  { %705 = vmatpush1.bf16.msra.mxu0 %v1323_v5  ;;  %v1392_v30 = vld [vmem:[#allocation2 + $0x30] ss:$8 sps:$4 sm:$0xff]   ;;  %v1393_v31 = vld [vmem:[#allocation2 + $0x44] ss:$8 sps:$4 sm:$0xff]   ;;  %v1347_v32 = vld [vmem:[#allocation2 + $0x1a0] ss:$8 sps:$4 sm:$0xff]  }
  0x1d   :  { %706 = vmatprep.subr.bf16.mxu0 %v1324_v6  ;;  %662 = vmatpush1.bf16.msra.mxu1 %v1380_v22  ;;  %v1348_v33 = vld [vmem:[#allocation2 + $0x1b4] ss:$8 sps:$4 sm:$0xff]   ;;  %v1398_v34 = vld [vmem:[#allocation2 + $0x40] ss:$8 sps:$4 sm:$0xff]   ;;  %v1350_v36 = vld [vmem:[#allocation2 + $0x1b0] ss:$8 sps:$4 sm:$0xff]  }
  0x1e   :  { %663 = vmatprep.subr.bf16.mxu1 %v1381_v23  ;;  %v1399_v35 = vld [vmem:[#allocation2 + $0x54] ss:$8 sps:$4 sm:$0xff]   ;;  %v1351_v37 = vld [vmem:[#allocation2 + $0x1c4] ss:$8 sps:$4 sm:$0xff]   ;;  %v1404_v38 = vld [vmem:[#allocation2 + $0x50] ss:$8 sps:$4 sm:$0xff]  }
  0x1f   :  { %v1405_v39 = vld [vmem:[#allocation2 + $0x64] ss:$8 sps:$4 sm:$0xff]   ;;  %v1353_v40 = vld [vmem:[#allocation2 + $0x1c0] ss:$8 sps:$4 sm:$0xff]   ;;  %v1354_v41 = vld [vmem:[#allocation2 + $0x1d4] ss:$8 sps:$4 sm:$0xff]  }
  0x20   :  { %707 = vmatpush1.bf16.msra.mxu0 %v1326_v7  ;;  %v1410_v42 = vld [vmem:[#allocation2 + $0x60] ss:$8 sps:$4 sm:$0xff]   ;;  %v1411_v43 = vld [vmem:[#allocation2 + $0x74] ss:$8 sps:$4 sm:$0xff]   ;;  %v1356_v44 = vld [vmem:[#allocation2 + $0x1d0] ss:$8 sps:$4 sm:$0xff]  }
  0x21   :  { %708 = vmatprep.subr.bf16.mxu0 %v1327_v8  ;;  %664 = vmatpush1.bf16.msra.mxu1 %v1386_v26  ;;  %v1357_v45 = vld [vmem:[#allocation2 + $0x1e4] ss:$8 sps:$4 sm:$0xff]   ;;  %v1416_v46 = vld [vmem:[#allocation2 + $0x70] ss:$8 sps:$4 sm:$0xff]   ;;  %v1359_v48 = vld [vmem:[#allocation2 + $0x1e0] ss:$8 sps:$4 sm:$0xff]  }
  0x22   :  { %665 = vmatprep.subr.bf16.mxu1 %v1387_v27  ;;  %v1417_v47 = vld [vmem:[#allocation2 + $0x84] ss:$8 sps:$4 sm:$0xff]   ;;  %v1360_v49 = vld [vmem:[#allocation2 + $0x1f4] ss:$8 sps:$4 sm:$0xff]   ;;  %v1422_v50 = vld [vmem:[#allocation2 + $0x80] ss:$8 sps:$4 sm:$0xff]  }
  0x23   :  { %v1362_v51 = vld [vmem:[#allocation2 + $0x1f0] ss:$8 sps:$4 sm:$0xff]   ;;  %v1423_v52 = vld [vmem:[#allocation2 + $0x94] ss:$8 sps:$4 sm:$0xff]   ;;  %v1365_v54 = vld [vmem:[#allocation2 + $0x204] ss:$8 sps:$4 sm:$0xff]  }
  0x24   :  { %709 = vmatpush1.bf16.msra.mxu0 %v1329_v9  ;;  %v43_v53 = vld [vmem:[%s1673_s0 + $0x10] sm:$0xff]  ;;  %v1429_v56 = vld [vmem:[#allocation2 + $0xa4] ss:$8 sps:$4 sm:$0xff]   ;;  %v1363_v59 = vld [vmem:[#allocation2 + $0x200] ss:$8 sps:$4 sm:$0xff]   ;;  %vm1515_vm1 = vmmov 0  }
  0x25   :  { %710 = vmatprep.subr.bf16.mxu0 %v1330_v10  ;;  %666 = vmatpush1.bf16.msra.mxu1 %v1392_v30  ;;  %v1428_v55 = vld [vmem:[#allocation2 + $0x90] ss:$8 sps:$4 sm:$0xff]   ;;  %v50_v57 = vpack.c.bf16 %v43_v53, %v43_v53  ;;  %v46_v58 = vld [vmem:[%s1673_s0 + $0x28] sm:$0xff]  ;;  %v1368_v61 = vld [vmem:[#allocation2 + $0x214] ss:$8 sps:$4 sm:$0xff]  }
  0x26   :  { %667 = vmatprep.subr.bf16.mxu1 %v1393_v31  ;;  %v53_v60 = vpack.c.bf16 %v46_v58, %v46_v58  ;;  %v1434_v62 = vld [vmem:[#allocation2 + $0xa0] ss:$8 sps:$4 sm:$0xff]   ;;  %v1435_v63 = vld [vmem:[#allocation2 + $0xb4] ss:$8 sps:$4 sm:$0xff]   ;;  %v1366_v1 = vld [vmem:[#allocation2 + $0x210] ss:$8 sps:$4 sm:$0xff]  }
  0x27   :  { %v42_v0 = vld [vmem:[%s1673_s0 + $0x8] sm:$0xff]  ;;  %v1440_v4 = vld [vmem:[#allocation2 + $0xb0] ss:$8 sps:$4 sm:$0xff]   ;;  %v1379_v7 = vld [vmem:[#allocation2 + $0x234] ss:$8 sps:$4 sm:$0xff]  }
  0x28   :  { %711 = vmatpush1.bf16.msra.mxu0 %v1332_v11  ;;  %v49_v2 = vpack.c.bf16 %v42_v0, %v42_v0  ;;  %v1373_v3 = vld [vmem:[#allocation2 + $0x224] ss:$8 sps:$4 sm:$0xff]   ;;  %v1371_v6 = vld [vmem:[#allocation2 + $0x220] ss:$8 sps:$4 sm:$0xff]   ;;  %v1447_v9 = vld [vmem:[#allocation2 + $0xd4] ss:$8 sps:$4 sm:$0xff]  }
  0x29   :  { %712 = vmatprep.subr.bf16.mxu0 %v1333_v12  ;;  %668 = vmatpush1.bf16.msra.mxu1 %v1398_v34  ;;  %v1441_v5 = vld [vmem:[#allocation2 + $0xc4] ss:$8 sps:$4 sm:$0xff]   ;;  %v1446_v8 = vld [vmem:[#allocation2 + $0xc0] ss:$8 sps:$4 sm:$0xff]   ;;  %v1377_v10 = vld [vmem:[#allocation2 + $0x230] ss:$8 sps:$4 sm:$0xff]  }
  0x2a   :  { %669 = vmatprep.subr.bf16.mxu1 %v1399_v35  ;;  %691 = vmatprep.mubr.bf16.mxu1 %v49_v2  ;;  %v1385_v11 = vld [vmem:[#allocation2 + $0x244] ss:$8 sps:$4 sm:$0xff]   ;;  %v1383_v12 = vld [vmem:[#allocation2 + $0x240] ss:$8 sps:$4 sm:$0xff]   ;;  %v1452_v13 = vld [vmem:[#allocation2 + $0xd0] ss:$8 sps:$4 sm:$0xff]  }
  0x2b   :  { %v1453_v14 = vld [vmem:[#allocation2 + $0xe4] ss:$8 sps:$4 sm:$0xff]   ;;  %v1459_v17 = vld [vmem:[#allocation2 + $0xf4] ss:$8 sps:$4 sm:$0xff]   ;;  %v1461_v20 = vld [vmem:[#allocation2 + $0xf0] ss:$8 sps:$4 sm:$0xff]  }
  0x2c   :  { %713 = vmatpush1.bf16.msra.mxu0 %v1335_v15  ;;  %v1391_v15 = vld [vmem:[#allocation2 + $0x254] ss:$8 sps:$4 sm:$0xff]   ;;  %v41_v21 = vld [vmem:[%s1673_s0] sm:$0xff]  ;;  %v1464_v27 = vld [vmem:[%s1676_s3 + $0x48] sm:$0xff]  }
  0x2d   :  { %714 = vmatprep.subr.bf16.mxu0 %v1336_v16  ;;  %670 = vmatpush1.bf16.msra.mxu1 %v1404_v38  ;;  %v1458_v16 = vld [vmem:[#allocation2 + $0xe0] ss:$8 sps:$4 sm:$0xff]   ;;  %v1466_v31 = vld [vmem:[%s1676_s3 + $0x50] sm:$0xff]   ;;  %v1468_v35 = vld [vmem:[%s1676_s3 + $0x58] sm:$0xff]  }
  0x2e   :  { %671 = vmatprep.subr.bf16.mxu1 %v1405_v39  ;;  %v1462_v22 = vld [vmem:[%s1676_s3 + $0x40] sm:$0xff]   ;;  %v1465_v30 = vld [vmem:[%s1676_s3 + $0x8] sm:$0xff]   ;;  %v1467_v34 = vld [vmem:[%s1676_s3 + $0x10] sm:$0xff]  }
  0x2f   :  { %v1395_v23 = vld [vmem:[#allocation2 + $0x260] ss:$8 sps:$4 sm:$0xff]   ;;  %v1469_v38 = vld [vmem:[%s1676_s3 + $0x18] sm:$0xff]   ;;  %v1457_v53 = vld [vmem:[#allocation2 + $0x304] ss:$8 sps:$4 sm:$0xff]  }
  0x30   :  { %715 = vmatpush1.bf16.msra.mxu0 %v1338_v18  ;;  %v1389_v18 = vld [vmem:[#allocation2 + $0x250] ss:$8 sps:$4 sm:$0xff]   ;;  %v1463_v26 = vld [vmem:[%s1676_s3] sm:$0xff]  }
  0x31   :  { %716 = vmatprep.subr.bf16.mxu0 %v1339_v19  ;;  %672 = vmatpush1.bf16.msra.mxu1 %v1410_v42  ;;  %v1397_v19 = vld [vmem:[#allocation2 + $0x264] ss:$8 sps:$4 sm:$0xff]   ;;  %v1477_v0 = vld [vmem:[%s1676_s3 + $0x38] sm:$0xff]  }
  0x32   :  { %673 = vmatprep.subr.bf16.mxu1 %v1411_v43  ;;  %v1470_v39 = vld [vmem:[%s1676_s3 + $0x60] sm:$0xff]   ;;  %v1425_v43 = vld [vmem:[#allocation2 + $0x2b0] ss:$8 sps:$4 sm:$0xff]  }
  0x33   :  { %v1471_v42 = vld [vmem:[%s1676_s3 + $0x20] sm:$0xff]  }
  0x34   :  { %717 = vmatpush1.bf16.msra.mxu0 %v1341_v24  ;;  %v1403_v24 = vld [vmem:[#allocation2 + $0x274] ss:$8 sps:$4 sm:$0xff]  }
  0x35   :  { %718 = vmatprep.subr.bf16.mxu0 %v1342_v25  ;;  %674 = vmatpush1.bf16.msra.mxu1 %v1416_v46  ;;  %v48_v25 = vpack.c.bf16 %v41_v21, %v41_v21  ;;  %v1439_v46 = vld [vmem:[#allocation2 + $0x2d4] ss:$8 sps:$4 sm:$0xff]  }
  0x36   :  { %675 = vmatprep.subr.bf16.mxu1 %v1417_v47  ;;  %v1437_v47 = vld [vmem:[#allocation2 + $0x2d0] ss:$8 sps:$4 sm:$0xff]  }
  0x38   :  { %719 = vmatpush1.bf16.msra.mxu0 %v1344_v28  ;;  %v1401_v28 = vld [vmem:[#allocation2 + $0x270] ss:$8 sps:$4 sm:$0xff]  }
  0x39   :  { %720 = vmatprep.subr.bf16.mxu0 %v1345_v29  ;;  %676 = vmatpush1.bf16.msra.mxu1 %v1422_v50  ;;  %v1409_v29 = vld [vmem:[#allocation2 + $0x284] ss:$8 sps:$4 sm:$0xff]   ;;  %v1451_v50 = vld [vmem:[#allocation2 + $0x2f4] ss:$8 sps:$4 sm:$0xff]  }
  0x3a   :  { %677 = vmatprep.subr.bf16.mxu1 %v1423_v52  ;;  %v45_v52 = vld [vmem:[%s1673_s0 + $0x20] sm:$0xff] }
  0x3c   :  { %721 = vmatpush1.bf16.msra.mxu0 %v1347_v32  ;;  %v1407_v32 = vld [vmem:[#allocation2 + $0x280] ss:$8 sps:$4 sm:$0xff]  }
  0x3d   :  { %722 = vmatprep.subr.bf16.mxu0 %v1348_v33  ;;  %678 = vmatpush1.bf16.msra.mxu1 %v1428_v55  ;;  %v1415_v33 = vld [vmem:[#allocation2 + $0x294] ss:$8 sps:$4 sm:$0xff]   ;;  %v1455_v55 = vld [vmem:[#allocation2 + $0x300] ss:$8 sps:$4 sm:$0xff]  }
  0x3e   :  { %679 = vmatprep.subr.bf16.mxu1 %v1429_v56  ;;  %v1513_v56 = vmov 0  }
  0x40   :  { %723 = vmatpush1.bf16.msra.mxu0 %v1350_v36  ;;  %v1413_v36 = vld [vmem:[#allocation2 + $0x290] ss:$8 sps:$4 sm:$0xff]  }
  0x41   :  { %724 = vmatprep.subr.bf16.mxu0 %v1351_v37  ;;  %680 = vmatpush1.bf16.msra.mxu1 %v1434_v62  ;;  %v1421_v37 = vld [vmem:[#allocation2 + $0x2a4] ss:$8 sps:$4 sm:$0xff]   ;;  %v1475_v62 = vld [vmem:[%s1676_s3 + $0x30] sm:$0xff]  }
  0x42   :  { %681 = vmatprep.subr.bf16.mxu1 %v1435_v63  ;;  %v1476_v63 = vld [vmem:[%s1676_s3 + $0x78] sm:$0xff]  }
  0x44   :  { %725 = vmatpush1.bf16.msra.mxu0 %v1353_v40  ;;  %v1419_v40 = vld [vmem:[#allocation2 + $0x2a0] ss:$8 sps:$4 sm:$0xff]  }
  0x45   :  { %726 = vmatprep.subr.bf16.mxu0 %v1354_v41  ;;  %682 = vmatpush1.bf16.msra.mxu1 %v1440_v4  ;;  %v1427_v41 = vld [vmem:[#allocation2 + $0x2b4] ss:$8 sps:$4 sm:$0xff]  }
  0x46   :  { %683 = vmatprep.subr.bf16.mxu1 %v1441_v5 }
  0x48   :  { %727 = vmatpush1.bf16.msra.mxu0 %v1356_v44  ;;  %v1433_v44 = vld [vmem:[#allocation2 + $0x2c4] ss:$8 sps:$4 sm:$0xff]  }
  0x49   :  { %728 = vmatprep.subr.bf16.mxu0 %v1357_v45  ;;  %684 = vmatpush1.bf16.msra.mxu1 %v1446_v8  ;;  %v1431_v45 = vld [vmem:[#allocation2 + $0x2c0] ss:$8 sps:$4 sm:$0xff]  }
  0x4a   :  { %685 = vmatprep.subr.bf16.mxu1 %v1447_v9  ;;  %v153_v9 = vld [vmem:[%s1675_s2] sm:$0x3] }
  0x4c   :  { %729 = vmatpush1.bf16.msra.mxu0 %v1359_v48  ;;  %v1445_v48 = vld [vmem:[#allocation2 + $0x2e4] ss:$8 sps:$4 sm:$0xff]  }
  0x4d   :  { %730 = vmatprep.subr.bf16.mxu0 %v1360_v49  ;;  %686 = vmatpush1.bf16.msra.mxu1 %v1452_v13  ;;  %v1443_v49 = vld [vmem:[#allocation2 + $0x2e0] ss:$8 sps:$4 sm:$0xff]  }
  0x4e   :  { %687 = vmatprep.subr.bf16.mxu1 %v1453_v14 }
  0x50   :  { %731 = vmatpush1.bf16.msra.mxu0 %v1362_v51  ;;  %v1449_v51 = vld [vmem:[#allocation2 + $0x2f0] ss:$8 sps:$4 sm:$0xff]  }
  0x51   :  { %741 = vmatprep.subr.bf16.mxu0 %v1365_v54  ;;  %688 = vmatpush1.bf16.msra.mxu1 %v1458_v16  ;;  %v52_v54 = vpack.c.bf16 %v45_v52, %v45_v52 }
  0x52   :  { %689 = vmatprep.subr.bf16.mxu1 %v1459_v17 }
  0x53   :  { %733 = vmatmul.mubr.bf16.vlgmr.msra.gmra.mrb[0].mxu0 %v50_v57  ;;  %v47_v57 = vld [vmem:[%s1673_s0 + $0x30] sm:$0xff] }
  0x54   :  { %742 = vmatpush1.bf16.msra.mxu0 %v1363_v59  ;;  %773 = vmatprep.mubr.bf16.mxu0 %v53_v60  ;;  %v54_v58 = vpack.c.bf16 %v47_v57, %v47_v57  ;;  %v1472_v59 = vld [vmem:[%s1676_s3 + $0x68] sm:$0xff]  }
  0x55   :  { %743 = vmatprep.subr.bf16.mxu0 %v1368_v61  ;;  %690 = vmatpush1.bf16.msra.mxu1 %v1461_v20  ;;  %v1473_v60 = vld [vmem:[%s1676_s3 + $0x28] sm:$0xff]   ;;  %v1474_v61 = vld [vmem:[%s1676_s3 + $0x70] sm:$0xff]  }
  0x56   :  { %1246 = vmatprep.subr.bf16.mxu1 %v1462_v22 }
  0x58   :  { %744 = vmatpush1.bf16.msra.mxu0 %v1366_v1  ;;  %692 = vmatmul.mubr.bf16.vlgmr.msra.gmra.mrb[0].mxu1 %v48_v25  ;;  %v1514_v1 = vmov 0.0  }
  0x59   :  { %745 = vmatprep.subr.bf16.mxu0 %v1373_v3  ;;  %1247 = vmatpush3.bf16.msra.mxu1 %v1463_v26  ;;  %v1479_v26 = vld [vmem:[%s1678_s5 + $0x8] sm:$0xff]  }
  0x5a   :  { %1248 = vmatprep.subr.bf16.mxu1 %v1464_v27  ;;  %v1480_v27 = vld [vmem:[%s1678_s5 + $0x10] sm:$0xff]  }
  0x5c   :  { %746 = vmatpush1.bf16.msra.mxu0 %v1371_v6  ;;  %v155_v6 = vlaneseq }
  0x5d   :  { %747 = vmatprep.subr.bf16.mxu0 %v1379_v7  ;;  %1249 = vmatpush3.bf16.msra.mxu1 %v1465_v30  ;;  %v1483_v30 = vld [vmem:[%s1678_s5 + $0x28] sm:$0xff]  }
  0x5e   :  { %1250 = vmatprep.subr.bf16.mxu1 %v1466_v31  ;;  %v156_v7 = vshrl.u32 %v155_v6, 7  ;;  %v1484_v31 = vld [vmem:[%s1678_s5 + $0x30] sm:$0xff]  }
  0x60   :  { %748 = vmatpush1.bf16.msra.mxu0 %v1377_v10  ;;  %v157_v8 = vsub.s32 0, %v156_v7  ;;  %v161_v10 = vsub.s32 1, %v156_v7 }
  0x61   :  { %749 = vmatprep.subr.bf16.mxu0 %v1385_v11  ;;  %1251 = vmatpush3.bf16.msra.mxu1 %v1467_v34  ;;  %v1220_v34 = vld [vmem:[%s1677_s4] ss:$0 sm:$0xff] }
  0x62   :  { %1252 = vmatprep.subr.bf16.mxu1 %v1468_v35  ;;  %v158_v11 = vrot.slane %v153_v9, %v157_v8 }
  0x64   :  { %750 = vmatpush1.bf16.msra.mxu0 %v1383_v12  ;;  %v162_v12 = vrot.slane %v153_v9, %v161_v10 }
  0x65   :  { %751 = vmatprep.subr.bf16.mxu0 %v1391_v15  ;;  %1253 = vmatpush3.bf16.msra.mxu1 %v1469_v38 }
  0x66   :  { %1254 = vmatprep.subr.bf16.mxu1 %v1470_v39 }
  0x68   :  { %752 = vmatpush1.bf16.msra.mxu0 %v1389_v18 }
  0x69   :  { %753 = vmatprep.subr.bf16.mxu0 %v1397_v19  ;;  %1255 = vmatpush3.bf16.msra.mxu1 %v1471_v42  ;;  %v1237_v42 = vld [vmem:[%s1679_s6] ss:$0 sm:$0xff] }
  0x6a   :  { %1256 = vmatprep.subr.bf16.mxu1 %v1472_v59 }
  0x6c   :  { %754 = vmatpush1.bf16.msra.mxu0 %v1395_v23 }
  0x6d   :  { %755 = vmatprep.subr.bf16.mxu0 %v1403_v24  ;;  %1257 = vmatpush3.bf16.msra.mxu1 %v1473_v60  ;;  %v1478_v24 = vld [vmem:[%s1678_s5] sm:$0xff]  }
  0x6e   :  { %1258 = vmatprep.subr.bf16.mxu1 %v1474_v61 }
  0x70   :  { %756 = vmatpush1.bf16.msra.mxu0 %v1401_v28  ;;  %v1481_v28 = vld [vmem:[%s1678_s5 + $0x18] sm:$0xff]  }
  0x71   :  { %757 = vmatprep.subr.bf16.mxu0 %v1409_v29  ;;  %1259 = vmatpush3.bf16.msra.mxu1 %v1475_v62  ;;  %v1482_v29 = vld [vmem:[%s1678_s5 + $0x20] sm:$0xff]  }
  0x72   :  { %1260 = vmatprep.subr.bf16.mxu1 %v1476_v63 }
  0x74   :  { %758 = vmatpush1.bf16.msra.mxu0 %v1407_v32  ;;  %v1485_v32 = vld [vmem:[%s1678_s5 + $0x38] sm:$0xff]  }
  0x75   :  { %759 = vmatprep.subr.bf16.mxu0 %v1415_v33  ;;  %1261 = vmatpush3.bf16.msra.mxu1 %v1477_v0 }
  0x76   :  { %1277 = vmatprep.subr.bf16.mxu1 %v1514_v1 }
  0x78   :  { %760 = vmatpush1.bf16.msra.mxu0 %v1413_v36 }
  0x79   :  { %761 = vmatprep.subr.bf16.mxu0 %v1421_v37 }
  0x7c   :  { %762 = vmatpush1.bf16.msra.mxu0 %v1419_v40 }
  0x7d   :  { %763 = vmatprep.subr.bf16.mxu0 %v1427_v41 }
  0x80   :  { %764 = vmatpush1.bf16.msra.mxu0 %v1425_v43 }
  0x81   :  { %765 = vmatprep.subr.bf16.mxu0 %v1433_v44 }
  0x84   :  { %766 = vmatpush1.bf16.msra.mxu0 %v1431_v45 }
  0x85   :  { %767 = vmatprep.subr.bf16.mxu0 %v1439_v46 }
  0x88   :  { %768 = vmatpush1.bf16.msra.mxu0 %v1437_v47 }
  0x89   :  { %769 = vmatprep.subr.bf16.mxu0 %v1445_v48 }
  0x8c   :  { %770 = vmatpush1.bf16.msra.mxu0 %v1443_v49 }
  0x8d   :  { %771 = vmatprep.subr.bf16.mxu0 %v1451_v50 }
  0x90   :  { %772 = vmatpush1.bf16.msra.mxu0 %v1449_v51 }
  0x91   :  { %782 = vmatprep.subr.bf16.mxu0 %v1457_v53 }
  0x93   :  { %774 = vmatmul.mubr.bf16.vlgmr.msra.gmra.mrb[0].mxu0 %v52_v54 }
  0x94   :  { %783 = vmatpush1.bf16.msra.mxu0 %v1455_v55  ;;  %814 = vmatprep.mubr.bf16.mxu0 %v1513_v56 }
  0x9f   :  { %1219 = vmatmul.mubr.msk.bf16.vlgmr.msra.gmra.mrb[0].mxu0 %vm655_vm0, %v54_v58 }
 0x12b   :  { %v693_v2 = vpop.f32.mrb[0].mxu1 }
 0x12c   :  { %v695_v3 = vpop.f32.mrb[1].mxu1  ;;  %v694_v13 = vadd.f32 %v693_v2, %v158_v11 }
 0x12d   :  { %v697_v4 = vpop.f32.mrb[2].mxu1  ;;  %v696_v14 = vadd.f32 %v695_v3, %v162_v12 }
 0x12e   :  { %v698_v5 = vpop.f32.mrb[3].mxu1 }
 0x172   :  { %v816_v15 = vpop.f32.mrb[0].mxu0 }
 0x173   :  { %v1298_v16 = vadd.f32 %v816_v15, %v694_v13  ;;  %v818_v17 = vpop.f32.mrb[1].mxu0 }
 0x174   :  { %v1300_v18 = vadd.f32 %v818_v17, %v696_v14  ;;  %v820_v19 = vpop.f32.mrb[2].mxu0 }
 0x175   :  { %v823_v20 = vmax.f32 %v1298_v16, 0.0  ;;  %v821_v21 = vpop.f32.mrb[3].mxu0 }
 0x176   :  { %v824_v22 = vmax.f32 %v1300_v18, 0.0 }
 0x177   :  { %v825_v25 = vpack.c.bf16 %v823_v20, %v823_v20 }
 0x178   :  { %v826_v23 = vpack.c.bf16 %v824_v22, %v824_v22 }
 0x17a   :  { %994 = vmatprep.mubr.bf16.mxu1 %v826_v23 }
 0x17b   :  { %995 = vmatmul.mubr.bf16.vlgmr.msra.gmra.mrb[4].mxu1 %v825_v25 }
 0x17c   :  { %1278 = vmatpush3.bf16.msra.mxu1 %v1478_v24  ;;  %1293 = vmatprep.mubr.msk.bf16.mxu1 %vm1515_vm1, %v1514_v1 }
 0x17d   :  { %1279 = vmatprep.subr.bf16.mxu1 %v1514_v1 }
 0x180   :  { %1280 = vmatpush3.bf16.msra.mxu1 %v1479_v26 }
 0x181   :  { %1281 = vmatprep.subr.bf16.mxu1 %v1514_v1 }
 0x184   :  { %1282 = vmatpush3.bf16.msra.mxu1 %v1480_v27 }
 0x185   :  { %1283 = vmatprep.subr.bf16.mxu1 %v1514_v1 }
 0x188   :  { %1284 = vmatpush3.bf16.msra.mxu1 %v1481_v28 }
 0x189   :  { %1285 = vmatprep.subr.bf16.mxu1 %v1514_v1 }
 0x18c   :  { %1286 = vmatpush3.bf16.msra.mxu1 %v1482_v29 }
 0x18d   :  { %1287 = vmatprep.subr.bf16.mxu1 %v1514_v1 }
 0x190   :  { %1288 = vmatpush3.bf16.msra.mxu1 %v1483_v30 }
 0x191   :  { %1289 = vmatprep.subr.bf16.mxu1 %v1514_v1 }
 0x194   :  { %1290 = vmatpush3.bf16.msra.mxu1 %v1484_v31 }
 0x195   :  { %1291 = vmatprep.subr.bf16.mxu1 %v1514_v1 }
 0x198   :  { %1292 = vmatpush3.bf16.msra.mxu1 %v1485_v32 }
 0x24e   :  { %v1262_v33 = vpop.f32.mrb[4].mxu1 }
 0x24f   :  { %v1263_v35 = vpop.f32.mrb[5].mxu1 }
 0x250   :  { %v1264_v36 = vadd.f32 %v1263_v35, %v1262_v33  ;;  %v1265_v37 = vpop.f32.mrb[6].mxu1 }
 0x251   :  { %v1266_v38 = vpop.f32.mrb[7].mxu1 }
 0x252   :  { %v997_v39 = vadd.f32 %v1264_v36, %v1220_v34 }
 0x254   :  { %v1002_v40 = vmax.f32 %v997_v39, 0.0 }
 0x256   :  { %v1003_v41 = vpack.c.bf16 %v1002_v40, %v1002_v40 }
 0x258   :  { %1294 = vmatmul.mubr.bf16.vlgmr.msra.gmra.mrb[8].mxu1 %v1003_v41 }
 0x32b   :  { %v1109_v43 = vpop.f32.mrb[8].mxu1 }
 0x32c   :  { %v1110_v44 = vadd.f32 %v1237_v42, %v1109_v43  ;;  %v1295_v45 = vpop.f32.mrb[9].mxu1 }
 0x32d   :  { %v1112_v46 = vpop.f32.mrb[10].mxu1 }
 0x32e   :  { %1115 = vst [vmem:[%s1680_s7] sm:$0xff] %v1110_v44  ;;  %v1296_v47 = vpop.f32.mrb[11].mxu1 }
 0x32f   :  { %1120 = vsyncpa [#allocation3], 1 }

</bundles_post_ra>
